<compile_context>
chip_gen: v5e
topology: v5e:2x2
jax: 0.10.0
libtpu: 0.0.40
codegen_flags: <defaults>
</compile_context>

<pallas_src>
import jax
import jax.numpy as jnp
from jax.experimental import pallas as pl
from jax.experimental.pallas import tpu as pltpu  # noqa: F401  (kept for scale-up path)

BN_EPS = 1e-5
LANE = 128


# --------------------------------------------------------------------------
# Single fused kernel: (matmul + BN(batch stats) + ReLU) x2  +  matmul head.
# No grid: every operand is one whole-array VMEM block.
# --------------------------------------------------------------------------
def fused_mlp_kernel(x_ref, w1_ref, g1_ref, b1_ref,
                     w2_ref, g2_ref, b2_ref, w3_ref, o_ref):
    def bn_relu(act, g_ref, b_ref):
        # act: (B, N) f32; BatchNorm1d training mode = biased batch variance
        mean = jnp.mean(act, axis=0, keepdims=True)                  # (1, N)
        var = jnp.mean((act - mean) ** 2, axis=0, keepdims=True)     # (1, N)
        xhat = (act - mean) * jax.lax.rsqrt(var + BN_EPS)
        return jnp.maximum(xhat * g_ref[...] + b_ref[...], 0.0)

    # Layer 1: bf16 operands on the MXU, f32 accumulation.
    x = x_ref[...].astype(w1_ref.dtype)
    a1 = jnp.dot(x, w1_ref[...], preferred_element_type=jnp.float32)
    h1 = bn_relu(a1, g1_ref, b1_ref)

    # Layer 2
    a2 = jnp.dot(h1.astype(w2_ref.dtype), w2_ref[...],
                 preferred_element_type=jnp.float32)
    h2 = bn_relu(a2, g2_ref, b2_ref)

    # Classifier head: W3 pre-padded to a lane-dense 128-wide output so this
    # store is a full-width unmasked vst (no vst.msk partial stores).
    o_ref[...] = jnp.dot(h2.astype(w3_ref.dtype), w3_ref[...],
                         preferred_element_type=jnp.float32)


def fused_forward(x, w1, g1, b1, w2, g2, b2, w3_padded):
    B = x.shape[0]
    n_pad = w3_padded.shape[1]
    return pl.pallas_call(
        fused_mlp_kernel,
        out_shape=jax.ShapeDtypeStruct((B, n_pad), jnp.float32),
        # no grid / no BlockSpecs: whole arrays -> VMEM, single launch
    )(x, w1, g1.reshape(1, -1), b1.reshape(1, -1),
      w2, g2.reshape(1, -1), b2.reshape(1, -1), w3_padded)


# --------------------------------------------------------------------------
# Model: deterministic parameter init + forward
# --------------------------------------------------------------------------
def init_params(key, d_in, h1, h2, d_out):
    k1, k2, k3 = jax.random.split(key, 3)
    # dense_binary_pca W_list[0] ~ Normal(0, 1), shape (N=1, D1, D2); only the
    # [0] slice is used in forward. Weights stored in bf16 (perf review): the
    # kernel is weight-bandwidth bound, and the MXU takes bf16 natively.
    return {
        "W1": jax.random.normal(k1, (d_in, h1), jnp.float32).astype(jnp.bfloat16),
        "W2": jax.random.normal(k2, (h1, h2), jnp.float32).astype(jnp.bfloat16),
        "W3": jax.random.normal(k3, (h2, d_out), jnp.float32).astype(jnp.bfloat16),
        # BatchNorm1d defaults: weight=1, bias=0 (kept f32)
        "g1": jnp.ones((h1,), jnp.float32),
        "b1": jnp.zeros((h1,), jnp.float32),
        "g2": jnp.ones((h2,), jnp.float32),
        "b2": jnp.zeros((h2,), jnp.float32),
    }


@jax.jit
def mnist_binary_pca_forward(params, x):
    d_out = params["W3"].shape[1]
    n_pad = max(LANE, ((d_out + LANE - 1) // LANE) * LANE)
    # Zero-pad the head weight to a lane-dense output width; slice after.
    w3p = jnp.pad(params["W3"], ((0, 0), (0, n_pad - d_out)))
    out_padded = fused_forward(
        x, params["W1"], params["g1"], params["b1"],
        params["W2"], params["g2"], params["b2"], w3p)
    return out_padded[:, :d_out]


# --------------------------------------------------------------------------
# Pure-JAX reference mirroring the same math (bf16 matmul operands, f32
# accumulation, f32 BatchNorm with biased batch variance, ReLU).
# --------------------------------------------------------------------------
def reference_forward(params, x):
    def bn_relu(a, g, b):
        m = jnp.mean(a, axis=0, keepdims=True)
        v = jnp.mean((a - m) ** 2, axis=0, keepdims=True)
        return jnp.maximum((a - m) / jnp.sqrt(v + BN_EPS) * g + b, 0.0)

    def mm(a, w):
        # Same operand precision as the kernel: bf16-rounded activations,
        # bf16-stored weights, f32 accumulate.
        a16 = a.astype(jnp.bfloat16).astype(jnp.float32)
        return jnp.dot(a16, w.astype(jnp.float32),
                       preferred_element_type=jnp.float32)

    h1 = bn_relu(mm(x, params["W1"]), params["g1"], params["b1"])
    h2 = bn_relu(mm(h1, params["W2"]), params["g2"], params["b2"])
    return mm(h2, params["W3"])


if __name__ == "__main__":
    # Small stand-in for the 784 -> 8192 -> 2048 -> 10 MLP.
    B, D_IN, H1, H2, D_OUT = 8, 256, 512, 256, 10

    key = jax.random.PRNGKey(0)
    kx, kp = jax.random.split(key)
    x = jax.random.normal(kx, (B, D_IN), jnp.float32)
    params = init_params(kp, D_IN, H1, H2, D_OUT)

    out = mnist_binary_pca_forward(params, x)
    out = jax.block_until_ready(out)

    ref = reference_forward(params, x)
    assert out.shape == (B, D_OUT)
    assert jnp.allclose(out, ref, atol=1e-2, rtol=1e-2), "mismatch vs reference"

    print("KERNEL_OK")
</pallas_src>

<mosaic_0001>
module attributes {stable_mosaic.version = 11 : i64} {
  func.func @fused_mlp_kernel(%arg0: memref<8x256xf32, #tpu.memory_space<vmem>>, %arg1: memref<256x512xbf16, #tpu.memory_space<vmem>>, %arg2: memref<1x512xf32, #tpu.memory_space<vmem>>, %arg3: memref<1x512xf32, #tpu.memory_space<vmem>>, %arg4: memref<512x256xbf16, #tpu.memory_space<vmem>>, %arg5: memref<1x256xf32, #tpu.memory_space<vmem>>, %arg6: memref<1x256xf32, #tpu.memory_space<vmem>>, %arg7: memref<256x128xbf16, #tpu.memory_space<vmem>>, %arg8: memref<8x128xf32, #tpu.memory_space<vmem>>) attributes {dimension_semantics = [], scalar_prefetch = 0 : i64, scratch_operands = 0 : i64, tpu.core_type = #tpu.core_type<tc>} {
    %c0 = arith.constant 0 : index
    %c0_0 = arith.constant 0 : index
    %0 = vector.load %arg0[%c0, %c0_0] : memref<8x256xf32, #tpu.memory_space<vmem>>, vector<8x256xf32>
    %1 = arith.truncf %0 : vector<8x256xf32> to vector<8x256xbf16>
    %c0_1 = arith.constant 0 : index
    %c0_2 = arith.constant 0 : index
    %2 = vector.load %arg1[%c0_1, %c0_2] : memref<256x512xbf16, #tpu.memory_space<vmem>>, vector<256x512xbf16>
    %cst = arith.constant dense<0.000000e+00> : vector<8x512xf32>
    %3 = tpu.matmul %1, %2, %cst {dimension_numbers = #tpu.dot_dimension_numbers<[1], [0], [0], [1], [0, 0, 1, 1], [], []>} : vector<8x256xbf16>, vector<256x512xbf16>, vector<8x512xf32> -> vector<8x512xf32>
    %cst_3 = arith.constant dense<0.000000e+00> : vector<512xf32>
    %4 = vector.multi_reduction <add>, %3, %cst_3 [0] : vector<8x512xf32> to vector<512xf32>
    %5 = vector.shape_cast %4 : vector<512xf32> to vector<1x512xf32>
    %cst_4 = arith.constant 8.000000e+00 : f32
    %6 = vector.broadcast %cst_4 : f32 to vector<1x512xf32>
    %7 = arith.divf %5, %6 : vector<1x512xf32>
    %8 = vector.broadcast %7 : vector<1x512xf32> to vector<8x512xf32>
    %9 = arith.subf %3, %8 : vector<8x512xf32>
    %10 = arith.mulf %9, %9 : vector<8x512xf32>
    %cst_5 = arith.constant dense<0.000000e+00> : vector<512xf32>
    %11 = vector.multi_reduction <add>, %10, %cst_5 [0] : vector<8x512xf32> to vector<512xf32>
    %12 = vector.shape_cast %11 : vector<512xf32> to vector<1x512xf32>
    %cst_6 = arith.constant 8.000000e+00 : f32
    %13 = vector.broadcast %cst_6 : f32 to vector<1x512xf32>
    %14 = arith.divf %12, %13 : vector<1x512xf32>
    %15 = vector.broadcast %7 : vector<1x512xf32> to vector<8x512xf32>
    %16 = arith.subf %3, %15 : vector<8x512xf32>
    %cst_7 = arith.constant 9.99999974E-6 : f32
    %17 = vector.broadcast %cst_7 : f32 to vector<1x512xf32>
    %18 = arith.addf %14, %17 : vector<1x512xf32>
    %19 = math.rsqrt %18 : vector<1x512xf32>
    %20 = vector.broadcast %19 : vector<1x512xf32> to vector<8x512xf32>
    %21 = arith.mulf %16, %20 : vector<8x512xf32>
    %c0_8 = arith.constant 0 : index
    %c0_9 = arith.constant 0 : index
    %22 = vector.load %arg2[%c0_8, %c0_9] : memref<1x512xf32, #tpu.memory_space<vmem>>, vector<1x512xf32>
    %23 = vector.broadcast %22 : vector<1x512xf32> to vector<8x512xf32>
    %24 = arith.mulf %21, %23 : vector<8x512xf32>
    %c0_10 = arith.constant 0 : index
    %c0_11 = arith.constant 0 : index
    %25 = vector.load %arg3[%c0_10, %c0_11] : memref<1x512xf32, #tpu.memory_space<vmem>>, vector<1x512xf32>
    %26 = vector.broadcast %25 : vector<1x512xf32> to vector<8x512xf32>
    %27 = arith.addf %24, %26 : vector<8x512xf32>
    %cst_12 = arith.constant 0.000000e+00 : f32
    %28 = vector.broadcast %cst_12 : f32 to vector<8x512xf32>
    %29 = arith.maximumf %27, %28 : vector<8x512xf32>
    %30 = arith.truncf %29 : vector<8x512xf32> to vector<8x512xbf16>
    %c0_13 = arith.constant 0 : index
    %c0_14 = arith.constant 0 : index
    %31 = vector.load %arg4[%c0_13, %c0_14] : memref<512x256xbf16, #tpu.memory_space<vmem>>, vector<512x256xbf16>
    %cst_15 = arith.constant dense<0.000000e+00> : vector<8x256xf32>
    %32 = tpu.matmul %30, %31, %cst_15 {dimension_numbers = #tpu.dot_dimension_numbers<[1], [0], [0], [1], [0, 0, 1, 1], [], []>} : vector<8x512xbf16>, vector<512x256xbf16>, vector<8x256xf32> -> vector<8x256xf32>
    %cst_16 = arith.constant dense<0.000000e+00> : vector<256xf32>
    %33 = vector.multi_reduction <add>, %32, %cst_16 [0] : vector<8x256xf32> to vector<256xf32>
    %34 = vector.shape_cast %33 : vector<256xf32> to vector<1x256xf32>
    %cst_17 = arith.constant 8.000000e+00 : f32
    %35 = vector.broadcast %cst_17 : f32 to vector<1x256xf32>
    %36 = arith.divf %34, %35 : vector<1x256xf32>
    %37 = vector.broadcast %36 : vector<1x256xf32> to vector<8x256xf32>
    %38 = arith.subf %32, %37 : vector<8x256xf32>
    %39 = arith.mulf %38, %38 : vector<8x256xf32>
    %cst_18 = arith.constant dense<0.000000e+00> : vector<256xf32>
    %40 = vector.multi_reduction <add>, %39, %cst_18 [0] : vector<8x256xf32> to vector<256xf32>
    %41 = vector.shape_cast %40 : vector<256xf32> to vector<1x256xf32>
    %cst_19 = arith.constant 8.000000e+00 : f32
    %42 = vector.broadcast %cst_19 : f32 to vector<1x256xf32>
    %43 = arith.divf %41, %42 : vector<1x256xf32>
    %44 = vector.broadcast %36 : vector<1x256xf32> to vector<8x256xf32>
    %45 = arith.subf %32, %44 : vector<8x256xf32>
    %cst_20 = arith.constant 9.99999974E-6 : f32
    %46 = vector.broadcast %cst_20 : f32 to vector<1x256xf32>
    %47 = arith.addf %43, %46 : vector<1x256xf32>
    %48 = math.rsqrt %47 : vector<1x256xf32>
    %49 = vector.broadcast %48 : vector<1x256xf32> to vector<8x256xf32>
    %50 = arith.mulf %45, %49 : vector<8x256xf32>
    %c0_21 = arith.constant 0 : index
    %c0_22 = arith.constant 0 : index
    %51 = vector.load %arg5[%c0_21, %c0_22] : memref<1x256xf32, #tpu.memory_space<vmem>>, vector<1x256xf32>
    %52 = vector.broadcast %51 : vector<1x256xf32> to vector<8x256xf32>
    %53 = arith.mulf %50, %52 : vector<8x256xf32>
    %c0_23 = arith.constant 0 : index
    %c0_24 = arith.constant 0 : index
    %54 = vector.load %arg6[%c0_23, %c0_24] : memref<1x256xf32, #tpu.memory_space<vmem>>, vector<1x256xf32>
    %55 = vector.broadcast %54 : vector<1x256xf32> to vector<8x256xf32>
    %56 = arith.addf %53, %55 : vector<8x256xf32>
    %cst_25 = arith.constant 0.000000e+00 : f32
    %57 = vector.broadcast %cst_25 : f32 to vector<8x256xf32>
    %58 = arith.maximumf %56, %57 : vector<8x256xf32>
    %59 = arith.truncf %58 : vector<8x256xf32> to vector<8x256xbf16>
    %c0_26 = arith.constant 0 : index
    %c0_27 = arith.constant 0 : index
    %60 = vector.load %arg7[%c0_26, %c0_27] : memref<256x128xbf16, #tpu.memory_space<vmem>>, vector<256x128xbf16>
    %cst_28 = arith.constant dense<0.000000e+00> : vector<8x128xf32>
    %61 = tpu.matmul %59, %60, %cst_28 {dimension_numbers = #tpu.dot_dimension_numbers<[1], [0], [0], [1], [0, 0, 1, 1], [], []>} : vector<8x256xbf16>, vector<256x128xbf16>, vector<8x128xf32> -> vector<8x128xf32>
    %c0_29 = arith.constant 0 : index
    %c0_30 = arith.constant 0 : index
    %62 = vector.load %arg8[%c0_29, %c0_30] : memref<8x128xf32, #tpu.memory_space<vmem>>, vector<8x128xf32>
    tpu.vector_store %arg8[%c0_29, %c0_30], %61 {strides = array<i32>} : memref<8x128xf32, #tpu.memory_space<vmem>>, vector<8x128xf32>,
    return
  }
}

</mosaic_0001>

<bundles_post_ra>
// kernel: mnist_binary_pca_forward.1
= control target key start
LH: loop header
LB: loop body
LE: loop exit
PB: predicated region body
PF: predicated region fallthrough
CT: control target
= control target key end

     0   :  { %13 = vsyncpa [#allocation3], 0  ;;  %s2500_s0 = inlined_call_operand.vmem [shape: f32[8,256], index: 0, kind: input, shape index: {}]   ;;  %s2501_s1 = inlined_call_operand.hbm [shape: bf16[256,512], index: 1, kind: input, shape index: {}]   ;;  %s2502_s2 = inlined_call_operand.vmem [shape: f32[1,512], index: 2, kind: input, shape index: {}]   ;;  %s2503_s3 = inlined_call_operand.vmem [shape: f32[1,512], index: 3, kind: input, shape index: {}]   ;;  %s2504_s4 = inlined_call_operand.hbm [shape: bf16[512,256], index: 4, kind: input, shape index: {}]   ;;  %s2505_s5 = inlined_call_operand.vmem [shape: f32[1,256], index: 5, kind: input, shape index: {}]   ;;  %s2506_s6 = inlined_call_operand.vmem [shape: f32[1,256], index: 6, kind: input, shape index: {}]   ;;  %s2507_s7 = inlined_call_operand.vmem [shape: bf16[256,128], index: 7, kind: input, shape index: {}]   ;;  %s2508_s8 = inlined_call_operand.hbm [shape: f32[8,128], index: 8, kind: output, shape index: {}]  }
   0x1   :  { %14 = vsyncpa [#allocation6], 0 }
   0x2   :  { %15 = vsyncpa [#allocation4], 0  ;;  %s22_s29 = sshll.u32 %s2501_s1, 4  ;;  %s2266_s30 = smov [#allocation2]   ;;  %s23_s29 = int_to_ptr.hbm [resolvable:$true] %s22_s29 }
   0x3   :  { %s24_s9 = sshll.u32 %s2266_s30, 4  ;;  %s39_s12 = sshll.u32 %s2504_s4, 4  ;;  %s25_s9 = int_to_ptr.vmem [resolvable:$true] %s24_s9  ;;  %s40_s12 = int_to_ptr.hbm [resolvable:$true] %s39_s12 }
   0x4   :  { %s2267_s13 = smov 256   ;;  %s2268_s14 = smov 16  }
   0x5   :  { %30 = dma.hbm_to_vmem [thread:$0]  %s23_s29, 8192, %s25_s9, [#allocation3], %s2267_s13, %s2267_s13, %s2268_s14  }
   0x6   :  { %s2269_s15 = smov [#allocation5]   ;;  %s2270_s17 = smov 128  }
   0x7   :  { %s41_s16 = sshll.u32 %s2269_s15, 4  ;;  %s2271_s18 = smov 8   ;;  %s42_s16 = int_to_ptr.vmem [resolvable:$true] %s41_s16 }
   0x8   :  { %47 = dma.hbm_to_vmem [thread:$0]  %s40_s12, 8192, %s42_s16, [#allocation6], %s2270_s17, %s2270_s17, %s2271_s18  }
   0x9   :  { %2260 = dma.done.wait [#allocation3], 8192  }
   0xa   :  { %2261 = vsyncadd [#allocation3], 4294959104 }
   0xb   :  { %2262 = dma.done.wait [#allocation6], 8192  }
   0xc   :  { %2263 = vsyncadd [#allocation6], 4294959104  ;;  %v1560_v0 = vld [vmem:[#allocation2 + $0xe0] sm:$0xf]  ;;  %v2052_v1 = vld [vmem:[#allocation2 + $0xec] sm:$0xf0] }
   0xd   :  { %v1688_v2 = vld [vmem:[#allocation2 + $0x1e0] sm:$0xf]  ;;  %v1561_v3 = vor.u32 %v2052_v1, %v1560_v0  ;;  %v2084_v4 = vld [vmem:[#allocation2 + $0x1ec] sm:$0xf0]  ;;  %v2050_v5 = vld [vmem:[#allocation2 + $0xe4] sm:$0xf] }
   0xe   :  { %v1562_v6 = vld [vmem:[#allocation2 + $0xf0] sm:$0xf0]  ;;  %v1689_v7 = vor.u32 %v2084_v4, %v1688_v2  ;;  %v2082_v9 = vld [vmem:[#allocation2 + $0x1e4] sm:$0xf]  ;;  %v1544_v11 = vld [vmem:[#allocation2 + $0xc0] sm:$0xf] }
   0xf   :  { %v1565_v8 = vor.u32 %v2050_v5, %v1562_v6  ;;  %v1690_v10 = vld [vmem:[#allocation2 + $0x1f0] sm:$0xf0]  ;;  %450 = vmatpush.bf16.msra.mxu0 %v1561_v3  ;;  %v2048_v13 = vld [vmem:[#allocation2 + $0xcc] sm:$0xf0]  ;;  %v1672_v14 = vld [vmem:[#allocation2 + $0x1c0] sm:$0xf] }
  0x10   :  { %v1693_v12 = vor.u32 %v2082_v9, %v1690_v10  ;;  %v2080_v15 = vld [vmem:[#allocation2 + $0x1cc] sm:$0xf0]  ;;  %463 = vmatpush.bf16.msra.mxu1 %v1689_v7  ;;  %v1545_v16 = vor.u32 %v2048_v13, %v1544_v11  ;;  %v2046_v18 = vld [vmem:[#allocation2 + $0xc4] sm:$0xf]  ;;  %v1546_v19 = vld [vmem:[#allocation2 + $0xd0] sm:$0xf0] }
  0x11   :  { %476 = vmatpush.bf16.msra.mxu2 %v1565_v8  ;;  %v1673_v17 = vor.u32 %v2080_v15, %v1672_v14  ;;  %v2078_v20 = vld [vmem:[#allocation2 + $0x1c4] sm:$0xf]  ;;  %v1549_v21 = vor.u32 %v2046_v18, %v1546_v19  ;;  %v1674_v22 = vld [vmem:[#allocation2 + $0x1d0] sm:$0xf0]  ;;  %v1528_v23 = vld [vmem:[#allocation2 + $0xa0] sm:$0xf] }
  0x12   :  { %489 = vmatpush.bf16.msra.mxu3 %v1693_v12  ;;  %v2044_v24 = vld [vmem:[#allocation2 + $0xac] sm:$0xf0]  ;;  %v1677_v25 = vor.u32 %v2078_v20, %v1674_v22  ;;  %v1656_v26 = vld [vmem:[#allocation2 + $0x1a0] sm:$0xf]  ;;  %v2042_v28 = vld [vmem:[#allocation2 + $0xa4] sm:$0xf] }
  0x13   :  { %v2076_v27 = vld [vmem:[#allocation2 + $0x1ac] sm:$0xf0]  ;;  %451 = vmatpush.bf16.msra.mxu0 %v1545_v16  ;;  %v1529_v29 = vor.u32 %v2044_v24, %v1528_v23  ;;  %v1530_v30 = vld [vmem:[#allocation2 + $0xb0] sm:$0xf0]  ;;  %v2074_v31 = vld [vmem:[#allocation2 + $0x1a4] sm:$0xf] }
  0x14   :  { %v1658_v32 = vld [vmem:[#allocation2 + $0x1b0] sm:$0xf0]  ;;  %464 = vmatpush.bf16.msra.mxu1 %v1673_v17  ;;  %v1657_v33 = vor.u32 %v2076_v27, %v1656_v26  ;;  %v1533_v34 = vor.u32 %v2042_v28, %v1530_v30  ;;  %v1512_v35 = vld [vmem:[#allocation2 + $0x80] sm:$0xf]  ;;  %v2040_v36 = vld [vmem:[#allocation2 + $0x8c] sm:$0xf0] }
  0x15   :  { %477 = vmatpush.bf16.msra.mxu2 %v1549_v21  ;;  %v1640_v37 = vld [vmem:[#allocation2 + $0x180] sm:$0xf]  ;;  %v1661_v38 = vor.u32 %v2074_v31, %v1658_v32  ;;  %v2072_v39 = vld [vmem:[#allocation2 + $0x18c] sm:$0xf0]  ;;  %v2038_v40 = vld [vmem:[#allocation2 + $0x84] sm:$0xf]  ;;  %v1513_v44 = vor.u32 %v2040_v36, %v1512_v35 }
  0x16   :  { %490 = vmatpush.bf16.msra.mxu3 %v1677_v25  ;;  %v1514_v41 = vld [vmem:[#allocation2 + $0x90] sm:$0xf0]  ;;  %v2070_v42 = vld [vmem:[#allocation2 + $0x184] sm:$0xf]  ;;  %v1641_v45 = vor.u32 %v2072_v39, %v1640_v37  ;;  %v1496_v47 = vld [vmem:[#allocation2 + $0x60] sm:$0xf] }
  0x17   :  { %v1642_v43 = vld [vmem:[#allocation2 + $0x190] sm:$0xf0]  ;;  %452 = vmatpush.bf16.msra.mxu0 %v1529_v29  ;;  %v1517_v46 = vor.u32 %v2038_v40, %v1514_v41  ;;  %v2036_v48 = vld [vmem:[#allocation2 + $0x6c] sm:$0xf0]  ;;  %v1624_v49 = vld [vmem:[#allocation2 + $0x160] sm:$0xf] }
  0x18   :  { %465 = vmatpush.bf16.msra.mxu1 %v1657_v33  ;;  %v1645_v50 = vor.u32 %v2070_v42, %v1642_v43  ;;  %v2068_v51 = vld [vmem:[#allocation2 + $0x16c] sm:$0xf0]  ;;  %v2034_v52 = vld [vmem:[#allocation2 + $0x64] sm:$0xf]  ;;  %v1498_v53 = vld [vmem:[#allocation2 + $0x70] sm:$0xf0]  ;;  %v1497_v56 = vor.u32 %v2036_v48, %v1496_v47 }
  0x19   :  { %478 = vmatpush.bf16.msra.mxu2 %v1533_v34  ;;  %v2066_v54 = vld [vmem:[#allocation2 + $0x164] sm:$0xf]  ;;  %v1626_v55 = vld [vmem:[#allocation2 + $0x170] sm:$0xf0]  ;;  %v1625_v57 = vor.u32 %v2068_v51, %v1624_v49  ;;  %v1501_v58 = vor.u32 %v2034_v52, %v1498_v53  ;;  %v1480_v59 = vld [vmem:[#allocation2 + $0x40] sm:$0xf] }
  0x1a   :  { %491 = vmatpush.bf16.msra.mxu3 %v1661_v38  ;;  %v2032_v60 = vld [vmem:[#allocation2 + $0x4c] sm:$0xf0]  ;;  %v1608_v61 = vld [vmem:[#allocation2 + $0x140] sm:$0xf]  ;;  %v1629_v62 = vor.u32 %v2066_v54, %v1626_v55  ;;  %v2030_v0 = vld [vmem:[#allocation2 + $0x44] sm:$0xf] }
  0x1b   :  { %453 = vmatpush.bf16.msra.mxu0 %v1513_v44  ;;  %v2064_v63 = vld [vmem:[#allocation2 + $0x14c] sm:$0xf0]  ;;  %v1482_v1 = vld [vmem:[#allocation2 + $0x50] sm:$0xf0]  ;;  %v2062_v2 = vld [vmem:[#allocation2 + $0x144] sm:$0xf]  ;;  %v1481_v4 = vor.u32 %v2032_v60, %v1480_v59 }
  0x1c   :  { %466 = vmatpush.bf16.msra.mxu1 %v1641_v45  ;;  %v1610_v3 = vld [vmem:[#allocation2 + $0x150] sm:$0xf0]  ;;  %v1609_v5 = vor.u32 %v2064_v63, %v1608_v61  ;;  %v1485_v6 = vor.u32 %v2030_v0, %v1482_v1  ;;  %v1464_v7 = vld [vmem:[#allocation2 + $0x20] sm:$0xf]  ;;  %v2028_v8 = vld [vmem:[#allocation2 + $0x2c] sm:$0xf0] }
  0x1d   :  { %479 = vmatpush.bf16.msra.mxu2 %v1517_v46  ;;  %v1592_v9 = vld [vmem:[#allocation2 + $0x120] sm:$0xf]  ;;  %v1613_v10 = vor.u32 %v2062_v2, %v1610_v3  ;;  %v2060_v11 = vld [vmem:[#allocation2 + $0x12c] sm:$0xf0]  ;;  %v2026_v12 = vld [vmem:[#allocation2 + $0x24] sm:$0xf]  ;;  %v1465_v16 = vor.u32 %v2028_v8, %v1464_v7 }
  0x1e   :  { %492 = vmatpush.bf16.msra.mxu3 %v1645_v50  ;;  %v1466_v13 = vld [vmem:[#allocation2 + $0x30] sm:$0xf0]  ;;  %v2058_v14 = vld [vmem:[#allocation2 + $0x124] sm:$0xf]  ;;  %v1448_v17 = vld [vmem:[#allocation2] sm:$0xf]  ;;  %v1593_v19 = vor.u32 %v2060_v11, %v1592_v9 }
  0x1f   :  { %454 = vmatpush.bf16.msra.mxu0 %v1497_v56  ;;  %v1594_v15 = vld [vmem:[#allocation2 + $0x130] sm:$0xf0]  ;;  %v2024_v18 = vld [vmem:[#allocation2 + $0xc] sm:$0xf0]  ;;  %v1469_v20 = vor.u32 %v2026_v12, %v1466_v13  ;;  %v1576_v21 = vld [vmem:[#allocation2 + $0x100] sm:$0xf] }
  0x20   :  { %467 = vmatpush.bf16.msra.mxu1 %v1625_v57  ;;  %v2056_v22 = vld [vmem:[#allocation2 + $0x10c] sm:$0xf0]  ;;  %v2022_v23 = vld [vmem:[#allocation2 + $0x4] sm:$0xf]  ;;  %v1597_v24 = vor.u32 %v2058_v14, %v1594_v15  ;;  %v1450_v25 = vld [vmem:[#allocation2 + $0x10] sm:$0xf0]  ;;  %v1449_v31 = vor.u32 %v2024_v18, %v1448_v17 }
  0x21   :  { %480 = vmatpush.bf16.msra.mxu2 %v1501_v58  ;;  %v2054_v26 = vld [vmem:[#allocation2 + $0x104] sm:$0xf]  ;;  %v1578_v27 = vld [vmem:[#allocation2 + $0x110] sm:$0xf0]  ;;  %v1568_v28 = vld [vmem:[#allocation2 + $0xe8] sm:$0xf]  ;;  %v1577_v35 = vor.u32 %v2056_v22, %v1576_v21  ;;  %v1453_v36 = vor.u32 %v2022_v23, %v1450_v25 }
  0x22   :  { %493 = vmatpush.bf16.msra.mxu3 %v1629_v62  ;;  %v2053_v29 = vld [vmem:[#allocation2 + $0xf4] sm:$0xf0]  ;;  %v1696_v30 = vld [vmem:[#allocation2 + $0x1e8] sm:$0xf]  ;;  %v2051_v33 = vld [vmem:[#allocation2 + $0xec] sm:$0xf]  ;;  %v1581_v40 = vor.u32 %v2054_v26, %v1578_v27 }
  0x23   :  { %455 = vmatpush.bf16.msra.mxu0 %v1481_v4  ;;  %v2085_v32 = vld [vmem:[#allocation2 + $0x1f4] sm:$0xf0]  ;;  %v1570_v34 = vld [vmem:[#allocation2 + $0xf8] sm:$0xf0]  ;;  %v2083_v37 = vld [vmem:[#allocation2 + $0x1ec] sm:$0xf]  ;;  %v1569_v41 = vor.u32 %v2053_v29, %v1568_v28 }
  0x24   :  { %468 = vmatpush.bf16.msra.mxu1 %v1609_v5  ;;  %v1698_v38 = vld [vmem:[#allocation2 + $0x1f8] sm:$0xf0]  ;;  %v62_v39 = vld [vmem:[%s2500_s0] sm:$0xff]  ;;  %v63_v42 = vld [vmem:[%s2500_s0 + $0x8] sm:$0xff]  ;;  %v1697_v43 = vor.u32 %v2085_v32, %v1696_v30  ;;  %v1573_v44 = vor.u32 %v2051_v33, %v1570_v34  ;;  %s1435_s10 = sshll.u32 %s2508_s8, 4  ;;  %s1436_s10 = int_to_ptr.hbm [resolvable:$true] %s1435_s10 }
  0x25   :  { %481 = vmatpush.bf16.msra.mxu2 %v1485_v6  ;;  %v1552_v45 = vld [vmem:[#allocation2 + $0xc8] sm:$0xf]  ;;  %v2049_v46 = vld [vmem:[#allocation2 + $0xd4] sm:$0xf0]  ;;  %v1701_v48 = vor.u32 %v2083_v37, %v1698_v38  ;;  %v2331_v49 = vpack.c.bf16 %v62_v39, %v62_v39  ;;  %v2047_v51 = vld [vmem:[#allocation2 + $0xcc] sm:$0xf]  ;;  %v2333_v53 = vpack.c.bf16 %v63_v42, %v63_v42 }
  0x26   :  { %494 = vmatpush.bf16.msra.mxu3 %v1613_v10  ;;  %v1680_v47 = vld [vmem:[#allocation2 + $0x1c8] sm:$0xf]  ;;  %v2081_v50 = vld [vmem:[#allocation2 + $0x1d4] sm:$0xf0]  ;;  %v1554_v52 = vld [vmem:[#allocation2 + $0xd8] sm:$0xf0]  ;;  %v1553_v56 = vor.u32 %v2049_v46, %v1552_v45 }
  0x27   :  { %456 = vmatpush.bf16.msra.mxu0 %v1465_v16  ;;  %v2079_v54 = vld [vmem:[#allocation2 + $0x1cc] sm:$0xf]  ;;  %v1682_v55 = vld [vmem:[#allocation2 + $0x1d8] sm:$0xf0]  ;;  %v1681_v57 = vor.u32 %v2081_v50, %v1680_v47  ;;  %v1557_v58 = vor.u32 %v2047_v51, %v1554_v52  ;;  %v1536_v59 = vld [vmem:[#allocation2 + $0xa8] sm:$0xf] }
  0x28   :  { %469 = vmatpush.bf16.msra.mxu1 %v1593_v19  ;;  %v2045_v60 = vld [vmem:[#allocation2 + $0xb4] sm:$0xf0]  ;;  %v1664_v61 = vld [vmem:[#allocation2 + $0x1a8] sm:$0xf]  ;;  %v1685_v62 = vor.u32 %v2079_v54, %v1682_v55  ;;  %v2043_v0 = vld [vmem:[#allocation2 + $0xac] sm:$0xf] }
  0x29   :  { %482 = vmatpush.bf16.msra.mxu2 %v1469_v20  ;;  %v2077_v63 = vld [vmem:[#allocation2 + $0x1b4] sm:$0xf0]  ;;  %v1538_v1 = vld [vmem:[#allocation2 + $0xb8] sm:$0xf0]  ;;  %v2075_v2 = vld [vmem:[#allocation2 + $0x1ac] sm:$0xf]  ;;  %v1537_v4 = vor.u32 %v2045_v60, %v1536_v59 }
  0x2a   :  { %495 = vmatpush.bf16.msra.mxu3 %v1597_v24  ;;  %v1666_v3 = vld [vmem:[#allocation2 + $0x1b8] sm:$0xf0]  ;;  %v1665_v5 = vor.u32 %v2077_v63, %v1664_v61  ;;  %v1541_v6 = vor.u32 %v2043_v0, %v1538_v1  ;;  %v1520_v7 = vld [vmem:[#allocation2 + $0x88] sm:$0xf]  ;;  %v2041_v8 = vld [vmem:[#allocation2 + $0x94] sm:$0xf0] }
  0x2b   :  { %457 = vmatpush.bf16.msra.mxu0 %v1449_v31  ;;  %v1648_v9 = vld [vmem:[#allocation2 + $0x188] sm:$0xf]  ;;  %v1669_v10 = vor.u32 %v2075_v2, %v1666_v3  ;;  %v2073_v11 = vld [vmem:[#allocation2 + $0x194] sm:$0xf0]  ;;  %v2039_v12 = vld [vmem:[#allocation2 + $0x8c] sm:$0xf]  ;;  %v1521_v16 = vor.u32 %v2041_v8, %v1520_v7 }
  0x2c   :  { %470 = vmatpush.bf16.msra.mxu1 %v1577_v35  ;;  %v1522_v13 = vld [vmem:[#allocation2 + $0x98] sm:$0xf0]  ;;  %v2071_v14 = vld [vmem:[#allocation2 + $0x18c] sm:$0xf]  ;;  %v1649_v17 = vor.u32 %v2073_v11, %v1648_v9  ;;  %v1504_v19 = vld [vmem:[#allocation2 + $0x68] sm:$0xf] }
  0x2d   :  { %483 = vmatpush.bf16.msra.mxu2 %v1453_v36  ;;  %v1650_v15 = vld [vmem:[#allocation2 + $0x198] sm:$0xf0]  ;;  %v1525_v18 = vor.u32 %v2039_v12, %v1522_v13  ;;  %v2037_v20 = vld [vmem:[#allocation2 + $0x74] sm:$0xf0]  ;;  %v1632_v21 = vld [vmem:[#allocation2 + $0x168] sm:$0xf] }
  0x2e   :  { %496 = vmatpush.bf16.msra.mxu3 %v1581_v40  ;;  %458 = vmatmul.bf16.vlgmr.msra.gmra.mxu0 %v2331_v49  ;;  %v1653_v22 = vor.u32 %v2071_v14, %v1650_v15  ;;  %v2069_v23 = vld [vmem:[#allocation2 + $0x174] sm:$0xf0]  ;;  %v2035_v24 = vld [vmem:[#allocation2 + $0x6c] sm:$0xf]  ;;  %v1506_v25 = vld [vmem:[#allocation2 + $0x78] sm:$0xf0]  ;;  %v1505_v28 = vor.u32 %v2037_v20, %v1504_v19 }
  0x2f   :  { %502 = vmatpush.bf16.msrb.mxu0 %v1569_v41  ;;  %471 = vmatmul.bf16.vlgmr.msra.gmra.mxu1 %v2333_v53  ;;  %v2067_v26 = vld [vmem:[#allocation2 + $0x16c] sm:$0xf]  ;;  %v1634_v27 = vld [vmem:[#allocation2 + $0x178] sm:$0xf0]  ;;  %v1633_v29 = vor.u32 %v2069_v23, %v1632_v21  ;;  %v1509_v30 = vor.u32 %v2035_v24, %v1506_v25  ;;  %v1488_v31 = vld [vmem:[#allocation2 + $0x48] sm:$0xf] }
  0x30   :  { %515 = vmatpush.bf16.msrb.mxu1 %v1697_v43  ;;  %484 = vmatmul.bf16.vlgmr.msra.gmra.mxu2 %v2331_v49  ;;  %v2033_v32 = vld [vmem:[#allocation2 + $0x54] sm:$0xf0]  ;;  %v1616_v33 = vld [vmem:[#allocation2 + $0x148] sm:$0xf]  ;;  %v1637_v34 = vor.u32 %v2067_v26, %v1634_v27  ;;  %v2031_v36 = vld [vmem:[#allocation2 + $0x4c] sm:$0xf] }
  0x31   :  { %528 = vmatpush.bf16.msrb.mxu2 %v1573_v44  ;;  %497 = vmatmul.bf16.vlgmr.msra.gmra.mxu3 %v2333_v53  ;;  %v2065_v35 = vld [vmem:[#allocation2 + $0x154] sm:$0xf0]  ;;  %v1490_v37 = vld [vmem:[#allocation2 + $0x58] sm:$0xf0]  ;;  %v2063_v38 = vld [vmem:[#allocation2 + $0x14c] sm:$0xf]  ;;  %v1489_v40 = vor.u32 %v2033_v32, %v1488_v31 }
  0x32   :  { %541 = vmatpush.bf16.msrb.mxu3 %v1701_v48  ;;  %v1618_v39 = vld [vmem:[#allocation2 + $0x158] sm:$0xf0]  ;;  %v1617_v41 = vor.u32 %v2065_v35, %v1616_v33  ;;  %v1493_v42 = vor.u32 %v2031_v36, %v1490_v37  ;;  %v1472_v43 = vld [vmem:[#allocation2 + $0x28] sm:$0xf]  ;;  %v2029_v44 = vld [vmem:[#allocation2 + $0x34] sm:$0xf0] }
  0x33   :  { %503 = vmatpush.bf16.msrb.mxu0 %v1553_v56  ;;  %v1600_v45 = vld [vmem:[#allocation2 + $0x128] sm:$0xf]  ;;  %v1621_v46 = vor.u32 %v2063_v38, %v1618_v39  ;;  %v2061_v47 = vld [vmem:[#allocation2 + $0x134] sm:$0xf0]  ;;  %v2027_v48 = vld [vmem:[#allocation2 + $0x2c] sm:$0xf]  ;;  %v1473_v54 = vor.u32 %v2029_v44, %v1472_v43 }
  0x34   :  { %516 = vmatpush.bf16.msrb.mxu1 %v1681_v57  ;;  %v1474_v50 = vld [vmem:[#allocation2 + $0x38] sm:$0xf0]  ;;  %v2059_v51 = vld [vmem:[#allocation2 + $0x12c] sm:$0xf]  ;;  %v1601_v55 = vor.u32 %v2061_v47, %v1600_v45  ;;  %v1456_v57 = vld [vmem:[#allocation2 + $0x8] sm:$0xf] }
  0x35   :  { %529 = vmatpush.bf16.msrb.mxu2 %v1557_v58  ;;  %v1602_v52 = vld [vmem:[#allocation2 + $0x138] sm:$0xf0]  ;;  %v1477_v56 = vor.u32 %v2027_v48, %v1474_v50  ;;  %v2025_v58 = vld [vmem:[#allocation2 + $0x14] sm:$0xf0]  ;;  %v1584_v59 = vld [vmem:[#allocation2 + $0x108] sm:$0xf] }
  0x36   :  { %542 = vmatpush.bf16.msrb.mxu3 %v1685_v62  ;;  %v1605_v60 = vor.u32 %v2059_v51, %v1602_v52  ;;  %v2057_v61 = vld [vmem:[#allocation2 + $0x114] sm:$0xf0]  ;;  %v2023_v62 = vld [vmem:[#allocation2 + $0xc] sm:$0xf]  ;;  %v1458_v63 = vld [vmem:[#allocation2 + $0x18] sm:$0xf0]  ;;  %v1457_v2 = vor.u32 %v2025_v58, %v1456_v57 }
  0x37   :  { %504 = vmatpush.bf16.msrb.mxu0 %v1537_v4  ;;  %v2055_v0 = vld [vmem:[#allocation2 + $0x10c] sm:$0xf]  ;;  %v1586_v1 = vld [vmem:[#allocation2 + $0x118] sm:$0xf0]  ;;  %v1585_v3 = vor.u32 %v2057_v61, %v1584_v59  ;;  %v1461_v4 = vor.u32 %v2023_v62, %v1458_v63  ;;  %v1760_v7 = vld [vmem:[#allocation5 + $0x70] sm:$0xf] }
  0x38   :  { %517 = vmatpush.bf16.msrb.mxu1 %v1665_v5  ;;  %v1589_v5 = vor.u32 %v2055_v0, %v1586_v1  ;;  %v2101_v8 = vld [vmem:[#allocation5 + $0x74] sm:$0xf0]  ;;  %v2099_v11 = vld [vmem:[#allocation5 + $0x64] sm:$0xf0]  ;;  %v1824_v14 = vld [vmem:[#allocation5 + $0xf0] sm:$0xf] }
  0x39   :  { %530 = vmatpush.bf16.msrb.mxu2 %v1541_v6  ;;  %v2272_v6 = vmov 8.0   ;;  %v1761_v9 = vor.u32 %v2101_v8, %v1760_v7  ;;  %v2117_v15 = vld [vmem:[#allocation5 + $0xf4] sm:$0xf0]  ;;  %v2115_v20 = vld [vmem:[#allocation5 + $0xe4] sm:$0xf0] }
  0x3a   :  { %543 = vmatpush.bf16.msrb.mxu3 %v1669_v10  ;;  %2174 = vrcp.f32 %v2272_v6  ;;  %v1752_v10 = vld [vmem:[#allocation5 + $0x60] sm:$0xf]  ;;  %v2095_v24 = vld [vmem:[#allocation5 + $0x44] sm:$0xf0]  ;;  %v1728_v33 = vld [vmem:[#allocation5 + $0x30] sm:$0xf] }
  0x3b   :  { %505 = vmatpush.bf16.msrb.mxu0 %v1521_v16  ;;  %v1753_v12 = vor.u32 %v2099_v11, %v1752_v10  ;;  %v1825_v16 = vor.u32 %v2117_v15, %v1824_v14  ;;  %v1736_v23 = vld [vmem:[#allocation5 + $0x40] sm:$0xf]  ;;  %v2111_v39 = vld [vmem:[#allocation5 + $0xc4] sm:$0xf0]  ;;  %v1712_v59 = vld [vmem:[#allocation5 + $0x10] sm:$0xf] }
  0x3c   :  { %518 = vmatpush.bf16.msrb.mxu1 %v1649_v17  ;;  %v1744_v17 = vld [vmem:[#allocation5 + $0x50] sm:$0xf]  ;;  %v1737_v27 = vor.u32 %v2095_v24, %v1736_v23  ;;  %v1800_v38 = vld [vmem:[#allocation5 + $0xc0] sm:$0xf]  ;;  %v2100_v14 = vld [vmem:[#allocation5 + $0x74] sm:$0xf] }
  0x3d   :  { %531 = vmatpush.bf16.msrb.mxu2 %v1525_v18  ;;  %v2097_v18 = vld [vmem:[#allocation5 + $0x54] sm:$0xf0]  ;;  %v1720_v45 = vld [vmem:[#allocation5 + $0x20] sm:$0xf]  ;;  %v2131_v24 = vld [vmem:[#allocation5 + $0x164] sm:$0xf0] }
  0x3e   :  { %544 = vmatpush.bf16.msrb.mxu3 %v1653_v22  ;;  %v1784_v1 = vld [vmem:[#allocation5 + $0xa0] sm:$0xf] }
  0x3f   :  { %506 = vmatpush.bf16.msrb.mxu0 %v1505_v28  ;;  %v1704_v8 = vld [vmem:[#allocation5] sm:$0xf] }
  0x40   :  { %519 = vmatpush.bf16.msrb.mxu1 %v1633_v29  ;;  %v2175_v13 = vpop.eup %2174  ;;  %v1808_v29 = vld [vmem:[#allocation5 + $0xd0] sm:$0xf]  ;;  %v1880_v23 = vld [vmem:[#allocation5 + $0x160] sm:$0xf] }
  0x41   :  { %532 = vmatpush.bf16.msrb.mxu2 %v1509_v30  ;;  %v579_v19 = vmul.f32 8.0, %v2175_v13  ;;  %v2113_v30 = vld [vmem:[#allocation5 + $0xd4] sm:$0xf0]  ;;  %vm583_vm0 = vweird.f32 %v2175_v13 }
  0x42   :  { %545 = vmatpush.bf16.msrb.mxu3 %v1637_v34  ;;  %v1809_v31 = vor.u32 %v2113_v30, %v1808_v29  ;;  %v2093_v34 = vld [vmem:[#allocation5 + $0x34] sm:$0xf0]  ;;  %v1768_v29 = vld [vmem:[#allocation5 + $0x80] sm:$0xf] }
  0x43   :  { %507 = vmatpush.bf16.msrb.mxu0 %v1489_v40  ;;  %v580_v26 = vsub.f32 1.0, %v579_v19  ;;  %v1729_v36 = vor.u32 %v2093_v34, %v1728_v33  ;;  %v2105_v19 = vld [vmem:[#allocation5 + $0x94] sm:$0xf0]  ;;  %v1952_v33 = vld [vmem:[#allocation5 + $0x1f0] sm:$0xf] }
  0x44   :  { %520 = vmatpush.bf16.msrb.mxu1 %v1617_v41  ;;  %v1801_v41 = vor.u32 %v2111_v39, %v1800_v38  ;;  %v2149_v34 = vld [vmem:[#allocation5 + $0x1f4] sm:$0xf0]  ;;  %v2116_v38 = vld [vmem:[#allocation5 + $0xf4] sm:$0xf]  ;;  %v1826_v39 = vld [vmem:[#allocation5 + $0xf8] sm:$0xf0] }
  0x45   :  { %533 = vmatpush.bf16.msrb.mxu2 %v1493_v42  ;;  %v581_v35 = vmul.f32 %v2175_v13, %v580_v26 }
  0x46   :  { %546 = vmatpush.bf16.msrb.mxu3 %v1621_v46  ;;  %v2091_v46 = vld [vmem:[#allocation5 + $0x24] sm:$0xf0] }
  0x47   :  { %508 = vmatpush.bf16.msrb.mxu0 %v1473_v54  ;;  %v582_v47 = vadd.f32 %v2175_v13, %v581_v35  ;;  %v1721_v51 = vor.u32 %v2091_v46, %v1720_v45  ;;  %v1792_v54 = vld [vmem:[#allocation5 + $0xb0] sm:$0xf]  ;;  %v2096_v46 = vld [vmem:[#allocation5 + $0x54] sm:$0xf] }
  0x48   :  { %521 = vmatpush.bf16.msrb.mxu1 %v1601_v55  ;;  %v2109_v55 = vld [vmem:[#allocation5 + $0xb4] sm:$0xf0] }
  0x49   :  { %534 = vmatpush.bf16.msrb.mxu2 %v1477_v56  ;;  %v1793_v57 = vor.u32 %v2109_v55, %v1792_v54  ;;  %v2346_v61 = vsel %vm583_vm0, %v2175_v13, %v582_v47  ;;  %v2133_v13 = vld [vmem:[#allocation5 + $0x174] sm:$0xf0]  ;;  %v1746_v47 = vld [vmem:[#allocation5 + $0x58] sm:$0xf0]  ;;  %v2147_v54 = vld [vmem:[#allocation5 + $0x1e4] sm:$0xf0] }
  0x4a   :  { %547 = vmatpush.bf16.msrb.mxu3 %v1605_v60  ;;  %v2089_v60 = vld [vmem:[#allocation5 + $0x14] sm:$0xf0]  ;;  %v2114_v55 = vld [vmem:[#allocation5 + $0xe4] sm:$0xf] }
  0x4b   :  { %509 = vmatpush.bf16.msrb.mxu0 %v1457_v2  ;;  %v1713_v63 = vor.u32 %v2089_v60, %v1712_v59  ;;  %v2107_v2 = vld [vmem:[#allocation5 + $0xa4] sm:$0xf0] }
  0x4c   :  { %522 = vmatpush.bf16.msrb.mxu1 %v1585_v3 }
  0x4d   :  { %535 = vmatpush.bf16.msrb.mxu2 %v1461_v4 }
  0x4e   :  { %548 = vmatpush.bf16.msrb.mxu3 %v1589_v5  ;;  %510 = vmatmul.bf16.vlgmr.msrb.gmra.mxu0 %v2331_v49  ;;  %v1785_v5 = vor.u32 %v2107_v2, %v1784_v1 }
  0x4f   :  { %523 = vmatmul.bf16.vlgmr.msrb.gmra.mxu1 %v2333_v53  ;;  %1093 = vmatpush.bf16.msra.mxu0 %v1761_v9  ;;  %v2087_v9 = vld [vmem:[#allocation5 + $0x4] sm:$0xf0] }
  0x50   :  { %536 = vmatmul.bf16.vlgmr.msrb.gmra.mxu2 %v2331_v49  ;;  %1106 = vmatpush.bf16.msra.mxu1 %v1825_v16  ;;  %v1745_v49 = vor.u32 %v2097_v18, %v1744_v17  ;;  %v1705_v11 = vor.u32 %v2087_v9, %v1704_v8  ;;  %v1762_v17 = vld [vmem:[#allocation5 + $0x78] sm:$0xf0]  ;;  %v1776_v18 = vld [vmem:[#allocation5 + $0x90] sm:$0xf]  ;;  %v2145_v9 = vld [vmem:[#allocation5 + $0x1d4] sm:$0xf0] }
  0x51   :  { %549 = vmatmul.bf16.vlgmr.msrb.gmra.mxu3 %v2333_v53  ;;  %v1816_v53 = vld [vmem:[#allocation5 + $0xe0] sm:$0xf]  ;;  %v1936_v8 = vld [vmem:[#allocation5 + $0x1d0] sm:$0xf] }
  0x52   :  { %v1817_v21 = vor.u32 %v2115_v20, %v1816_v53  ;;  %v1765_v53 = vor.u32 %v2100_v14, %v1762_v17  ;;  %v1777_v20 = vor.u32 %v2105_v19, %v1776_v18  ;;  %v1856_v18 = vld [vmem:[#allocation5 + $0x130] sm:$0xf]  ;;  %v2125_v19 = vld [vmem:[#allocation5 + $0x134] sm:$0xf0] }
  0x53   :  { %1094 = vmatpush.bf16.msra.mxu0 %v1753_v12  ;;  %v1888_v12 = vld [vmem:[#allocation5 + $0x170] sm:$0xf] }
  0x54   :  { %1107 = vmatpush.bf16.msra.mxu1 %v1817_v21  ;;  %v1889_v16 = vor.u32 %v2133_v13, %v1888_v12  ;;  %v2112_v12 = vld [vmem:[#allocation5 + $0xd4] sm:$0xf]  ;;  %v1810_v13 = vld [vmem:[#allocation5 + $0xd8] sm:$0xf0] }
  0x55   :  { %v1813_v17 = vor.u32 %v2112_v12, %v1810_v13  ;;  %v2106_v12 = vld [vmem:[#allocation5 + $0xa4] sm:$0xf]  ;;  %v1786_v13 = vld [vmem:[#allocation5 + $0xa8] sm:$0xf0] }
  0x56   :  { %1119 = vmatpush.bf16.msra.mxu2 %v1889_v16 }
  0x57   :  { %1095 = vmatpush.bf16.msra.mxu0 %v1745_v49 }
  0x58   :  { %1108 = vmatpush.bf16.msra.mxu1 %v1809_v31 }
  0x5b   :  { %1096 = vmatpush.bf16.msra.mxu0 %v1737_v27  ;;  %v1881_v27 = vor.u32 %v2131_v24, %v1880_v23 }
  0x5c   :  { %1109 = vmatpush.bf16.msra.mxu1 %v1801_v41  ;;  %v1829_v41 = vor.u32 %v2116_v38, %v1826_v39  ;;  %v2123_v38 = vld [vmem:[#allocation5 + $0x124] sm:$0xf0] }
  0x5d   :  { %1120 = vmatpush.bf16.msra.mxu2 %v1881_v27  ;;  %v2110_v27 = vld [vmem:[#allocation5 + $0xc4] sm:$0xf] }
  0x5f   :  { %1097 = vmatpush.bf16.msra.mxu0 %v1729_v36 }
  0x60   :  { %1110 = vmatpush.bf16.msra.mxu1 %v1793_v57  ;;  %v1818_v57 = vld [vmem:[#allocation5 + $0xe8] sm:$0xf0] }
  0x61   :  { %v1821_v60 = vor.u32 %v2114_v55, %v1818_v57 }
  0x63   :  { %1098 = vmatpush.bf16.msra.mxu0 %v1721_v51  ;;  %v1749_v51 = vor.u32 %v2096_v46, %v1746_v47 }
  0x64   :  { %1111 = vmatpush.bf16.msra.mxu1 %v1785_v5 }
  0x67   :  { %1099 = vmatpush.bf16.msra.mxu0 %v1713_v63  ;;  %v2127_v63 = vld [vmem:[#allocation5 + $0x144] sm:$0xf0] }
  0x68   :  { %1112 = vmatpush.bf16.msra.mxu1 %v1777_v20  ;;  %v2092_v20 = vld [vmem:[#allocation5 + $0x34] sm:$0xf] }
  0x6b   :  { %1100 = vmatpush.bf16.msra.mxu0 %v1705_v11  ;;  %v1937_v11 = vor.u32 %v2145_v9, %v1936_v8 }
  0x6f   :  { %1145 = vmatpush.bf16.msrb.mxu0 %v1765_v53  ;;  %v1857_v53 = vor.u32 %v2125_v19, %v1856_v18  ;;  %v2119_v18 = vld [vmem:[#allocation5 + $0x104] sm:$0xf0]  ;;  %v2086_v19 = vld [vmem:[#allocation5 + $0x4] sm:$0xf] }
  0xab   :  { %v459_v22 = vpop.f32.mrf.mxu0 }
  0xac   :  { %v472_v25 = vpop.f32.mrf.mxu1 }
  0xad   :  { %v473_v28 = vadd.f32 %v472_v25, %v459_v22  ;;  %v2098_v25 = vld [vmem:[#allocation5 + $0x64] sm:$0xf] }
  0xaf   :  { %v554_v32 = vrot.slane %v473_v28, 4 }
  0xb1   :  { %v555_v37 = vadd.f32 %v554_v32, %v473_v28  ;;  %v2103_v32 = vld [vmem:[#allocation5 + $0x84] sm:$0xf0] }
  0xb2   :  { %v1769_v36 = vor.u32 %v2103_v32, %v1768_v29 }
  0xb3   :  { %v485_v40 = vpop.f32.mrf.mxu2  ;;  %v556_v42 = vrot.slane %v555_v37, 2  ;;  %v461_v44 = vpop.f32.mrf.mxu0 }
  0xb4   :  { %v498_v43 = vpop.f32.mrf.mxu3  ;;  %v474_v50 = vpop.f32.mrf.mxu1  ;;  %1113 = vmatpush.bf16.msra.mxu1 %v1769_v36 }
  0xb5   :  { %v2343_v48 = vadd.f32 %v498_v43, %v485_v40  ;;  %v557_v52 = vadd.f32 %v556_v42, %v555_v37  ;;  %v1953_v37 = vor.u32 %v2149_v34, %v1952_v33  ;;  %v1872_v42 = vld [vmem:[#allocation5 + $0x150] sm:$0xf]  ;;  %v2129_v43 = vld [vmem:[#allocation5 + $0x154] sm:$0xf0] }
  0xb6   :  { %v1873_v45 = vor.u32 %v2129_v43, %v1872_v42  ;;  %v2090_v43 = vld [vmem:[#allocation5 + $0x24] sm:$0xf] }
  0xb7   :  { %v560_v56 = vrot.slane %v2343_v48, 4  ;;  %v558_v58 = vrot.slane %v557_v52, 1  ;;  %1132 = vmatpush.bf16.msra.mxu3 %v1953_v37  ;;  %v1848_v37 = vld [vmem:[#allocation5 + $0x120] sm:$0xf] }
  0xb8   :  { %1158 = vmatpush.bf16.msrb.mxu1 %v1829_v41  ;;  %1121 = vmatpush.bf16.msra.mxu2 %v1873_v45  ;;  %v1849_v42 = vor.u32 %v2123_v38, %v1848_v37  ;;  %v2388_v38 = vld [vmem:[%s2502_s2] sm:$0xf] }
  0xb9   :  { %v561_v62 = vadd.f32 %v560_v56, %v2343_v48  ;;  %v559_v0 = vadd.f32 %v558_v58, %v557_v52  ;;  %v1944_v52 = vld [vmem:[#allocation5 + $0x1e0] sm:$0xf] }
  0xba   :  { %v1945_v56 = vor.u32 %v2147_v54, %v1944_v52  ;;  %v2108_v52 = vld [vmem:[#allocation5 + $0xb4] sm:$0xf] }
  0xbb   :  { %v562_v3 = vrot.slane %v561_v62, 2  ;;  %v487_v4 = vpop.f32.mrf.mxu2  ;;  %v585_v6 = vmul.f32 %v2346_v61, %v559_v0 }
  0xbc   :  { %v500_v7 = vpop.f32.mrf.mxu3  ;;  %1133 = vmatpush.bf16.msra.mxu3 %v1945_v56  ;;  %v1738_v4 = vld [vmem:[#allocation5 + $0x48] sm:$0xf0]  ;;  %1159 = vmatpush.bf16.msrb.mxu1 %v1821_v60  ;;  %v2121_v60 = vld [vmem:[#allocation5 + $0x114] sm:$0xf0] }
  0xbd   :  { %v563_v10 = vadd.f32 %v562_v3, %v561_v62  ;;  %v2350_v15 = vsub.f32 %v473_v28, %v585_v6  ;;  %v1754_v28 = vld [vmem:[#allocation5 + $0x68] sm:$0xf0]  ;;  %v1864_v62 = vld [vmem:[#allocation5 + $0x140] sm:$0xf]  ;;  %v2094_v3 = vld [vmem:[#allocation5 + $0x44] sm:$0xf] }
  0xbe   :  { %v1757_v31 = vor.u32 %v2098_v25, %v1754_v28  ;;  %v1865_v2 = vor.u32 %v2127_v63, %v1864_v62  ;;  %v1741_v7 = vor.u32 %v2094_v3, %v1738_v4  ;;  %v1928_v25 = vld [vmem:[#allocation5 + $0x1c0] sm:$0xf] }
  0xbf   :  { %v564_v49 = vrot.slane %v563_v10, 1  ;;  %v593_v21 = vmul.f32 %v2350_v15, %v2350_v15 }
  0xc0   :  { %1146 = vmatpush.bf16.msrb.mxu0 %v1757_v31  ;;  %1122 = vmatpush.bf16.msra.mxu2 %v1865_v2  ;;  %v1802_v31 = vld [vmem:[#allocation5 + $0xc8] sm:$0xf0] }
  0xc1   :  { %v565_v22 = vadd.f32 %v564_v49, %v563_v10  ;;  %v597_v26 = vrot.slane %v593_v21, 4  ;;  %1134 = vmatpush.bf16.msra.mxu3 %v1937_v11  ;;  %1160 = vmatpush.bf16.msrb.mxu1 %v1813_v17  ;;  %v1805_v36 = vor.u32 %v2110_v27, %v1802_v31  ;;  %v1832_v17 = vld [vmem:[#allocation5 + $0x100] sm:$0xf]  ;;  %v1904_v27 = vld [vmem:[#allocation5 + $0x190] sm:$0xf] }
  0xc3   :  { %v586_v30 = vmul.f32 %v2346_v61, %v565_v22  ;;  %v598_v35 = vadd.f32 %v597_v26, %v593_v21  ;;  %v1730_v21 = vld [vmem:[#allocation5 + $0x38] sm:$0xf0]  ;;  %v2143_v26 = vld [vmem:[#allocation5 + $0x1c4] sm:$0xf0] }
  0xc4   :  { %1147 = vmatpush.bf16.msrb.mxu0 %v1749_v51  ;;  %v1733_v24 = vor.u32 %v2092_v20, %v1730_v21  ;;  %1123 = vmatpush.bf16.msra.mxu2 %v1857_v53  ;;  %v2141_v51 = vld [vmem:[#allocation5 + $0x1b4] sm:$0xf0]  ;;  %v1789_v20 = vor.u32 %v2106_v12, %v1786_v13  ;;  %v1833_v21 = vor.u32 %v2119_v18, %v1832_v17 }
  0xc5   :  { %v2356_v40 = vsub.f32 %v2343_v48, %v586_v30  ;;  %v599_v44 = vrot.slane %v598_v35, 2  ;;  %v1929_v30 = vor.u32 %v2143_v26, %v1928_v25  ;;  %1161 = vmatpush.bf16.msrb.mxu1 %v1805_v36  ;;  %v1890_v26 = vld [vmem:[#allocation5 + $0x178] sm:$0xf0] }
  0xc7   :  { %v594_v50 = vmul.f32 %v2356_v40, %v2356_v40  ;;  %v600_v48 = vadd.f32 %v599_v44, %v598_v35  ;;  %1135 = vmatpush.bf16.msra.mxu3 %v1929_v30  ;;  %v1722_v44 = vld [vmem:[#allocation5 + $0x28] sm:$0xf0] }
  0xc8   :  { %1148 = vmatpush.bf16.msrb.mxu0 %v1741_v7  ;;  %v1725_v47 = vor.u32 %v2090_v43, %v1722_v44  ;;  %1124 = vmatpush.bf16.msra.mxu2 %v1849_v42  ;;  %v2139_v7 = vld [vmem:[#allocation5 + $0x1a4] sm:$0xf0]  ;;  %v2130_v42 = vld [vmem:[#allocation5 + $0x164] sm:$0xf]  ;;  %v1882_v43 = vld [vmem:[#allocation5 + $0x168] sm:$0xf0] }
  0xc9   :  { %v603_v58 = vrot.slane %v594_v50, 4  ;;  %v601_v0 = vrot.slane %v600_v48, 1 }
  0xcb   :  { %v511_v59 = vpop.f32.mrf.mxu0  ;;  %v604_v5 = vadd.f32 %v603_v58, %v594_v50  ;;  %v602_v10 = vadd.f32 %v601_v0, %v600_v48  ;;  %v1920_v50 = vld [vmem:[#allocation5 + $0x1b0] sm:$0xf]  ;;  %v1794_v48 = vld [vmem:[#allocation5 + $0xb8] sm:$0xf0]  ;;  %v2088_v0 = vld [vmem:[#allocation5 + $0x14] sm:$0xf] }
  0xcc   :  { %v524_v1 = vpop.f32.mrf.mxu1  ;;  %1149 = vmatpush.bf16.msrb.mxu0 %v1733_v24  ;;  %v1921_v55 = vor.u32 %v2141_v51, %v1920_v50  ;;  %v1797_v58 = vor.u32 %v2108_v52, %v1794_v48  ;;  %v2135_v50 = vld [vmem:[#allocation5 + $0x184] sm:$0xf0]  ;;  %v1770_v48 = vld [vmem:[#allocation5 + $0x88] sm:$0xf0] }
  0xcd   :  { %v2360_v6 = vadd.f32 %v524_v1, %v511_v59  ;;  %v605_v14 = vrot.slane %v604_v5, 2  ;;  %v621_v49 = vmul.f32 %v602_v10, %v2346_v61  ;;  %v1840_v59 = vld [vmem:[#allocation5 + $0x110] sm:$0xf]  ;;  %v1714_v1 = vld [vmem:[#allocation5 + $0x18] sm:$0xf0] }
  0xce   :  { %1136 = vmatpush.bf16.msra.mxu3 %v1921_v55  ;;  %v1841_v63 = vor.u32 %v2121_v60, %v1840_v59  ;;  %1162 = vmatpush.bf16.msrb.mxu1 %v1797_v58  ;;  %v1717_v4 = vor.u32 %v2088_v0, %v1714_v1  ;;  %v2102_v55 = vld [vmem:[#allocation5 + $0x84] sm:$0xf]  ;;  %v2148_v60 = vld [vmem:[#allocation5 + $0x1f4] sm:$0xf] }
  0xcf   :  { %v566_v16 = vrot.slane %v2360_v6, 4  ;;  %v606_v22 = vadd.f32 %v605_v14, %v604_v5  ;;  %v2365_v28 = vadd.f32 1e-05, %v621_v49  ;;  %v1912_v5 = vld [vmem:[#allocation5 + $0x1a0] sm:$0xf]  ;;  %v1773_v59 = vor.u32 %v2102_v55, %v1770_v48 }
  0xd0   :  { %1150 = vmatpush.bf16.msrb.mxu0 %v1725_v47  ;;  %1125 = vmatpush.bf16.msra.mxu2 %v1841_v63  ;;  %v1913_v11 = vor.u32 %v2139_v7, %v1912_v5  ;;  %v1896_v47 = vld [vmem:[#allocation5 + $0x180] sm:$0xf]  ;;  %v675_v63 = vperm.slane %v2388_v38, 0 }
  0xd1   :  { %v567_v23 = vadd.f32 %v566_v16, %v2360_v6  ;;  %v607_v32 = vrot.slane %v606_v22, 1  ;;  %2176 = vrsqrt.f32 %v2365_v28  ;;  %vm635_vm2 = vweird.f32 %v2365_v28 }
  0xd2   :  { %1137 = vmatpush.bf16.msra.mxu3 %v1913_v11  ;;  %1163 = vmatpush.bf16.msrb.mxu1 %v1789_v20  ;;  %v1897_v58 = vor.u32 %v2135_v50, %v1896_v47 }
  0xd3   :  { %v537_v29 = vpop.f32.mrf.mxu2  ;;  %v568_v33 = vrot.slane %v567_v23, 2  ;;  %v513_v35 = vpop.f32.mrf.mxu0  ;;  %v608_v45 = vadd.f32 %v607_v32, %v606_v22  ;;  %v1706_v22 = vld [vmem:[#allocation5 + $0x8] sm:$0xf0] }
  0xd4   :  { %v550_v34 = vpop.f32.mrf.mxu3  ;;  %v526_v41 = vpop.f32.mrf.mxu1  ;;  %1151 = vmatpush.bf16.msrb.mxu0 %v1717_v4  ;;  %v1709_v25 = vor.u32 %v2086_v19, %v1706_v22  ;;  %1126 = vmatpush.bf16.msra.mxu2 %v1833_v21  ;;  %v1778_v35 = vld [vmem:[#allocation5 + $0x98] sm:$0xf0] }
  0xd5   :  { %v2368_v39 = vadd.f32 %v550_v34, %v537_v29  ;;  %v569_v46 = vadd.f32 %v568_v33, %v567_v23  ;;  %v622_v56 = vmul.f32 %v608_v45, %v2346_v61  ;;  %v2132_v23 = vld [vmem:[#allocation5 + $0x174] sm:$0xf]  ;;  %v2137_v29 = vld [vmem:[#allocation5 + $0x194] sm:$0xf0]  ;;  %v1874_v4 = vld [vmem:[#allocation5 + $0x158] sm:$0xf0] }
  0xd6   :  { %v1893_v32 = vor.u32 %v2132_v23, %v1890_v26  ;;  %v1905_v33 = vor.u32 %v2137_v29, %v1904_v27  ;;  %v2104_v34 = vld [vmem:[#allocation5 + $0x94] sm:$0xf]  ;;  %v676_v26 = vperm.slane %v2388_v38, 1 }
  0xd7   :  { %v572_v54 = vrot.slane %v2368_v39, 4  ;;  %v570_v57 = vrot.slane %v569_v46, 1  ;;  %v2373_v2 = vadd.f32 1e-05, %v622_v56  ;;  %v2375_v8 = vpop.eup %2176  ;;  %v1781_v37 = vor.u32 %v2104_v34, %v1778_v35  ;;  %v2124_v34 = vld [vmem:[#allocation5 + $0x134] sm:$0xf] }
  0xd8   :  { %v630_v14 = vmul.f32 %v2375_v8, %v2365_v28  ;;  %1152 = vmatpush.bf16.msrb.mxu0 %v1709_v25  ;;  %1171 = vmatpush.bf16.msrb.mxu2 %v1893_v32  ;;  %vm636_vm1 = vweird.f32 %v2375_v8  ;;  %v2128_v28 = vld [vmem:[#allocation5 + $0x154] sm:$0xf]  ;;  %v1938_v25 = vld [vmem:[#allocation5 + $0x1d8] sm:$0xf0] }
  0xd9   :  { %v573_v62 = vadd.f32 %v572_v54, %v2368_v39  ;;  %v571_v3 = vadd.f32 %v570_v57, %v569_v46  ;;  %2178 = vrsqrt.f32 %v2373_v2  ;;  %1138 = vmatpush.bf16.msra.mxu3 %v1905_v33  ;;  %v1885_v46 = vor.u32 %v2130_v42, %v1882_v43  ;;  %1164 = vmatpush.bf16.msrb.mxu1 %v1781_v37  ;;  %v2403_v57 = vld [vmem:[%s2503_s3] sm:$0xf]  ;;  %vm637_vm3 = vmor %vm635_vm2, %vm636_vm1  ;;  %v1858_v35 = vld [vmem:[#allocation5 + $0x138] sm:$0xf0] }
  0xda   :  { %v631_v24 = vmul.f32 %v2375_v8, %v630_v14  ;;  %v2146_v14 = vld [vmem:[#allocation5 + $0x1e4] sm:$0xf]  ;;  %vm645_vm5 = vweird.f32 %v2373_v2  ;;  %v690_v37 = vperm.slane %v2403_v57, 1 }
  0xdb   :  { %v574_v9 = vrot.slane %v573_v62, 2  ;;  %v539_v10 = vpop.f32.mrf.mxu2  ;;  %v587_v49 = vmul.f32 %v2346_v61, %v571_v3  ;;  %v2142_v43 = vld [vmem:[#allocation5 + $0x1c4] sm:$0xf] }
  0xdc   :  { %v552_v16 = vpop.f32.mrf.mxu3  ;;  %v632_v36 = vmul.f32 0.5, %v631_v24  ;;  %1172 = vmatpush.bf16.msrb.mxu2 %v1885_v46  ;;  %v2144_v24 = vld [vmem:[#allocation5 + $0x1d4] sm:$0xf]  ;;  %v2122_v46 = vld [vmem:[#allocation5 + $0x124] sm:$0xf] }
  0xdd   :  { %v575_v53 = vadd.f32 %v574_v9, %v573_v62  ;;  %v2383_v30 = vsub.f32 %v2360_v6, %v587_v49  ;;  %v1954_v62 = vld [vmem:[#allocation5 + $0x1f8] sm:$0xf0]  ;;  %1139 = vmatpush.bf16.msra.mxu3 %v1897_v58  ;;  %v1877_v9 = vor.u32 %v2128_v28, %v1874_v4  ;;  %1165 = vmatpush.bf16.msrb.mxu1 %v1773_v59  ;;  %v1946_v16 = vld [vmem:[#allocation5 + $0x1e8] sm:$0xf0] }
  0xde   :  { %v633_v45 = vsub.f32 1.5, %v632_v36  ;;  %v1957_v7 = vor.u32 %v2148_v60, %v1954_v62  ;;  %v1949_v17 = vor.u32 %v2146_v14, %v1946_v16  ;;  %v1941_v29 = vor.u32 %v2144_v24, %v1938_v25  ;;  %v1922_v58 = vld [vmem:[#allocation5 + $0x1b8] sm:$0xf0]  ;;  %v2136_v14 = vld [vmem:[#allocation5 + $0x194] sm:$0xf] }
  0xdf   :  { %v576_v31 = vrot.slane %v575_v53, 1  ;;  %v595_v41 = vmul.f32 %v2383_v30, %v2383_v30  ;;  %v2392_v44 = vpop.eup %2178  ;;  %v1906_v16 = vld [vmem:[#allocation5 + $0x198] sm:$0xf0]  ;;  %v677_v24 = vperm.slane %v2388_v38, 2 }
  0xe0   :  { %v640_v51 = vmul.f32 %v2392_v44, %v2373_v2  ;;  %v634_v56 = vmul.f32 %v2375_v8, %v633_v45  ;;  %vm646_vm4 = vweird.f32 %v2392_v44  ;;  %1173 = vmatpush.bf16.msrb.mxu2 %v1877_v9  ;;  %v1930_v45 = vld [vmem:[#allocation5 + $0x1c8] sm:$0xf0] }
  0xe1   :  { %v577_v6 = vadd.f32 %v576_v31, %v575_v53  ;;  %v609_v52 = vrot.slane %v595_v41, 4  ;;  %1184 = vmatpush.bf16.msrb.mxu3 %v1957_v7  ;;  %v1866_v53 = vld [vmem:[#allocation5 + $0x148] sm:$0xf0]  ;;  %vm647_vm6 = vmor %vm645_vm5, %vm646_vm4  ;;  %v2118_v7 = vld [vmem:[#allocation5 + $0x104] sm:$0xf] }
  0xe2   :  { %v641_v0 = vmul.f32 %v2392_v44, %v640_v51  ;;  %v638_v5 = vsel %vm637_vm3, %v2375_v8, %v634_v56  ;;  %v1850_v51 = vld [vmem:[#allocation5 + $0x128] sm:$0xf0]  ;;  %v2140_v56 = vld [vmem:[#allocation5 + $0x1b4] sm:$0xf] }
  0xe3   :  { %v588_v54 = vmul.f32 %v2346_v61, %v577_v6  ;;  %v610_v1 = vadd.f32 %v609_v52, %v595_v41  ;;  %v669_v10 = vmul.f32 %v638_v5, %v2350_v15  ;;  %v2126_v15 = vld [vmem:[#allocation5 + $0x144] sm:$0xf]  ;;  %v1861_v41 = vor.u32 %v2124_v34, %v1858_v35  ;;  %v1914_v5 = vld [vmem:[#allocation5 + $0x1a8] sm:$0xf0] }
  0xe4   :  { %v642_v11 = vmul.f32 0.5, %v641_v0  ;;  %v1869_v20 = vor.u32 %v2126_v15, %v1866_v53  ;;  %v1853_v55 = vor.u32 %v2122_v46, %v1850_v51  ;;  %v1925_v60 = vor.u32 %v2140_v56, %v1922_v58  ;;  %v1842_v0 = vld [vmem:[#allocation5 + $0x118] sm:$0xf0]  ;;  %v1834_v9 = vld [vmem:[#allocation5 + $0x108] sm:$0xf0] }
  0xe5   :  { %v2410_v3 = vsub.f32 %v2368_v39, %v588_v54  ;;  %v611_v12 = vrot.slane %v610_v1, 2  ;;  %v689_v39 = vperm.slane %v2403_v57, 0  ;;  %v683_v8 = vmul.f32 %v675_v63, %v669_v10  ;;  %1185 = vmatpush.bf16.msrb.mxu3 %v1949_v17  ;;  %v2120_v63 = vld [vmem:[#allocation5 + $0x114] sm:$0xf]  ;;  %v1898_v15 = vld [vmem:[#allocation5 + $0x188] sm:$0xf0] }
  0xe6   :  { %v643_v18 = vsub.f32 1.5, %v642_v11  ;;  %1174 = vmatpush.bf16.msrb.mxu2 %v1869_v20  ;;  %v1845_v4 = vor.u32 %v2120_v63, %v1842_v0  ;;  %v678_v34 = vperm.slane %v2388_v38, 3 }
  0xe7   :  { %v596_v13 = vmul.f32 %v2410_v3, %v2410_v3  ;;  %v612_v19 = vadd.f32 %v611_v12, %v610_v1  ;;  %v697_v27 = vadd.f32 %v689_v39, %v683_v8  ;;  %v2138_v1 = vld [vmem:[#allocation5 + $0x1a4] sm:$0xf]  ;;  %v1909_v8 = vor.u32 %v2136_v14, %v1906_v16  ;;  %v2153_v14 = vld [vmem:[%s2507_s7 + $0x18] sm:$0xff] }
  0xe8   :  { %v644_v21 = vmul.f32 %v2392_v44, %v643_v18  ;;  %v1917_v11 = vor.u32 %v2138_v1, %v1914_v5  ;;  %v2155_v1 = vld [vmem:[%s2507_s7 + $0x28] sm:$0xff]  ;;  %v2165_v16 = vld [vmem:[%s2507_s7 + $0x78] sm:$0xff] }
  0xe9   :  { %v615_v49 = vrot.slane %v596_v13, 4  ;;  %v613_v22 = vrot.slane %v612_v19, 1  ;;  %v701_v36 = vmax.f32 %v697_v27, 0.0  ;;  %1186 = vmatpush.bf16.msrb.mxu3 %v1941_v29  ;;  %v691_v29 = vperm.slane %v2403_v57, 2 }
  0xea   :  { %v648_v31 = vsel %vm647_vm6, %v2392_v44, %v644_v21  ;;  %v1933_v44 = vor.u32 %v2142_v43, %v1930_v45  ;;  %1175 = vmatpush.bf16.msrb.mxu2 %v1861_v41  ;;  %v692_v41 = vperm.slane %v2403_v57, 3 }
  0xeb   :  { %v616_v23 = vadd.f32 %v615_v49, %v596_v13  ;;  %v614_v32 = vadd.f32 %v613_v22, %v612_v19  ;;  %v670_v2 = vmul.f32 %v648_v31, %v2356_v40  ;;  %v705_v50 = vpack.c.bf16 %v701_v36, %v701_v36  ;;  %v2134_v49 = vld [vmem:[#allocation5 + $0x184] sm:$0xf] }
  0xec   :  { %v1837_v13 = vor.u32 %v2118_v7, %v1834_v9  ;;  %v1901_v21 = vor.u32 %v2134_v49, %v1898_v15  ;;  %v2154_v7 = vld [vmem:[%s2507_s7 + $0x20] sm:$0xff]  ;;  %v2152_v49 = vld [vmem:[%s2507_s7 + $0x10] sm:$0xff] }
  0xed   :  { %v617_v33 = vrot.slane %v616_v23, 2  ;;  %v623_v6 = vmul.f32 %v614_v32, %v2346_v61  ;;  %v684_v47 = vmul.f32 %v676_v26, %v670_v2  ;;  %1101 = vmatmul.bf16.vlgmr.msra.gmra.mxu0 %v705_v50  ;;  %1187 = vmatpush.bf16.msrb.mxu3 %v1933_v44  ;;  %v2164_v15 = vld [vmem:[%s2507_s7 + $0x70] sm:$0xff] }
  0xee   :  { %1176 = vmatpush.bf16.msrb.mxu2 %v1853_v55 }
  0xef   :  { %v618_v42 = vadd.f32 %v617_v33, %v616_v23  ;;  %v627_v52 = vadd.f32 1e-05, %v623_v6  ;;  %v698_v40 = vadd.f32 %v690_v37, %v684_v47 }
  0xf1   :  { %v619_v54 = vrot.slane %v618_v42, 1  ;;  %2180 = vrsqrt.f32 %v627_v52  ;;  %v702_v59 = vmax.f32 %v698_v40, 0.0  ;;  %1188 = vmatpush.bf16.msrb.mxu3 %v1925_v60  ;;  %vm655_vm8 = vweird.f32 %v627_v52  ;;  %v2156_v60 = vld [vmem:[%s2507_s7 + $0x30] sm:$0xff] }
  0xf2   :  { %1177 = vmatpush.bf16.msrb.mxu2 %v1845_v4 }
  0xf3   :  { %v620_v48 = vadd.f32 %v619_v54, %v618_v42  ;;  %v706_v28 = vpack.c.bf16 %v702_v59, %v702_v59 }
  0xf5   :  { %v624_v62 = vmul.f32 %v620_v48, %v2346_v61  ;;  %1114 = vmatmul.bf16.vlgmr.msra.gmra.mxu1 %v706_v28  ;;  %1189 = vmatpush.bf16.msrb.mxu3 %v1917_v11  ;;  %v2157_v48 = vld [vmem:[%s2507_s7 + $0x38] sm:$0xff] }
  0xf6   :  { %1178 = vmatpush.bf16.msrb.mxu2 %v1837_v13  ;;  %1401 = vmatpush.bf16.msra.mxu0 %v2157_v48 }
  0xf7   :  { %v628_v10 = vadd.f32 1e-05, %v624_v62  ;;  %v2181_v12 = vpop.eup %2180  ;;  %1414 = vmatpush.bf16.msra.mxu1 %v2165_v16 }
  0xf8   :  { %v650_v39 = vmul.f32 %v2181_v12, %v627_v52  ;;  %vm656_vm7 = vweird.f32 %v2181_v12 }
  0xf9   :  { %2182 = vrsqrt.f32 %v628_v10  ;;  %1190 = vmatpush.bf16.msrb.mxu3 %v1909_v8  ;;  %vm657_vm9 = vmor %vm655_vm8, %vm656_vm7  ;;  %vm665_vm11 = vweird.f32 %v628_v10 }
  0xfa   :  { %v651_v17 = vmul.f32 %v2181_v12, %v650_v39  ;;  %1402 = vmatpush.bf16.msra.mxu0 %v2156_v60  ;;  %v1261_v60 = vld [vmem:[%s2506_s6] sm:$0x3] }
  0xfb   :  { %1415 = vmatpush.bf16.msra.mxu1 %v2164_v15 }
  0xfc   :  { %v652_v18 = vmul.f32 0.5, %v651_v17 }
  0xfd   :  { %1153 = vmatmul.bf16.vlgmr.msrb.gmra.mxu0 %v705_v50  ;;  %1191 = vmatpush.bf16.msrb.mxu3 %v1901_v21 }
  0xfe   :  { %v653_v53 = vsub.f32 1.5, %v652_v18  ;;  %1403 = vmatpush.bf16.msra.mxu0 %v2155_v1 }
  0xff   :  { %v2183_v19 = vpop.eup %2182 }
 0x100   :  { %v660_v20 = vmul.f32 %v2183_v19, %v628_v10  ;;  %v654_v22 = vmul.f32 %v2181_v12, %v653_v53  ;;  %vm666_vm10 = vweird.f32 %v2183_v19 }
 0x101   :  { %vm667_vm12 = vmor %vm665_vm11, %vm666_vm10 }
 0x102   :  { %v661_v23 = vmul.f32 %v2183_v19, %v660_v20  ;;  %v658_v25 = vsel %vm657_vm9, %v2181_v12, %v654_v22  ;;  %1404 = vmatpush.bf16.msra.mxu0 %v2154_v7 }
 0x103   :  { %v671_v27 = vmul.f32 %v658_v25, %v2383_v30  ;;  %v2163_v25 = vld [vmem:[%s2507_s7 + $0x68] sm:$0xff] }
 0x104   :  { %v662_v26 = vmul.f32 0.5, %v661_v23  ;;  %1416 = vmatpush.bf16.msra.mxu1 %v2163_v25 }
 0x105   :  { %v685_v32 = vmul.f32 %v677_v24, %v671_v27  ;;  %1166 = vmatmul.bf16.vlgmr.msrb.gmra.mxu1 %v706_v28  ;;  %v2151_v24 = vld [vmem:[%s2507_s7 + $0x8] sm:$0xff] }
 0x106   :  { %v663_v31 = vsub.f32 1.5, %v662_v26  ;;  %1405 = vmatpush.bf16.msra.mxu0 %v2153_v14 }
 0x107   :  { %v699_v35 = vadd.f32 %v691_v29, %v685_v32  ;;  %v2150_v32 = vld [vmem:[%s2507_s7] sm:$0xff] }
 0x108   :  { %v664_v33 = vmul.f32 %v2183_v19, %v663_v31 }
 0x109   :  { %v703_v37 = vmax.f32 %v699_v35, 0.0 }
 0x10a   :  { %v668_v2 = vsel %vm667_vm12, %v2183_v19, %v664_v33  ;;  %1406 = vmatpush.bf16.msra.mxu0 %v2152_v49  ;;  %v2162_v33 = vld [vmem:[%s2507_s7 + $0x60] sm:$0xff] }
 0x10b   :  { %v672_v36 = vmul.f32 %v668_v2, %v2410_v3  ;;  %v707_v30 = vpack.c.bf16 %v703_v37, %v703_v37  ;;  %1417 = vmatpush.bf16.msra.mxu1 %v2162_v33  ;;  %v2161_v37 = vld [vmem:[%s2507_s7 + $0x58] sm:$0xff] }
 0x10d   :  { %v686_v6 = vmul.f32 %v678_v34, %v672_v36  ;;  %1127 = vmatmul.bf16.vlgmr.msra.gmra.mxu2 %v707_v30 }
 0x10e   :  { %1407 = vmatpush.bf16.msra.mxu0 %v2151_v24 }
 0x10f   :  { %v700_v42 = vadd.f32 %v692_v41, %v686_v6  ;;  %1418 = vmatpush.bf16.msra.mxu1 %v2161_v37 }
 0x111   :  { %v704_v43 = vmax.f32 %v700_v42, 0.0 }
 0x112   :  { %1408 = vmatpush.bf16.msra.mxu0 %v2150_v32 }
 0x113   :  { %v708_v45 = vpack.c.bf16 %v704_v43, %v704_v43  ;;  %v2160_v43 = vld [vmem:[%s2507_s7 + $0x50] sm:$0xff] }
 0x114   :  { %1419 = vmatpush.bf16.msra.mxu1 %v2160_v43 }
 0x115   :  { %1140 = vmatmul.bf16.vlgmr.msra.gmra.mxu3 %v708_v45 }
 0x11d   :  { %1179 = vmatmul.bf16.vlgmr.msrb.gmra.mxu2 %v707_v30 }
 0x125   :  { %1192 = vmatmul.bf16.vlgmr.msrb.gmra.mxu3 %v708_v45 }
 0x16a   :  { %v1102_v46 = vpop.f32.mrf.mxu0 }
 0x172   :  { %v1115_v47 = vpop.f32.mrf.mxu1  ;;  %v1104_v50 = vpop.f32.mrf.mxu0 }
 0x173   :  { %v1116_v55 = vadd.f32 %v1115_v47, %v1102_v46  ;;  %v2159_v47 = vld [vmem:[%s2507_s7 + $0x48] sm:$0xff] }
 0x174   :  { %1420 = vmatpush.bf16.msra.mxu1 %v2159_v47 }
 0x17a   :  { %v1117_v38 = vpop.f32.mrf.mxu1  ;;  %v1154_v44 = vpop.f32.mrf.mxu0 }
 0x17b   :  { %v2158_v38 = vld [vmem:[%s2507_s7 + $0x40] sm:$0xff] }
 0x17c   :  { %1421 = vmatpush.bf16.msra.mxu1 %v2158_v38 }
 0x182   :  { %v1167_v51 = vpop.f32.mrf.mxu1  ;;  %v1156_v52 = vpop.f32.mrf.mxu0 }
 0x183   :  { %v1168_v9 = vadd.f32 %v1167_v51, %v1154_v44 }
 0x18a   :  { %v1169_v3 = vpop.f32.mrf.mxu1 }
 0x190   :  { %v1128_v54 = vpop.f32.mrf.mxu2 }
 0x191   :  { %v1129_v57 = vadd.f32 %v1128_v54, %v1116_v55 }
 0x198   :  { %v1141_v40 = vpop.f32.mrf.mxu3  ;;  %v1130_v58 = vpop.f32.mrf.mxu2 }
 0x199   :  { %v1142_v56 = vadd.f32 %v1141_v40, %v1129_v57 }
 0x19b   :  { %v1197_v59 = vrot.slane %v1142_v56, 4 }
 0x19d   :  { %v1198_v62 = vadd.f32 %v1197_v59, %v1142_v56 }
 0x19f   :  { %v1199_v63 = vrot.slane %v1198_v62, 2 }
 0x1a0   :  { %v1143_v0 = vpop.f32.mrf.mxu3  ;;  %v1180_v4 = vpop.f32.mrf.mxu2 }
 0x1a1   :  { %v1200_v28 = vadd.f32 %v1199_v63, %v1198_v62  ;;  %v1181_v12 = vadd.f32 %v1180_v4, %v1168_v9 }
 0x1a3   :  { %v1201_v5 = vrot.slane %v1200_v28, 1 }
 0x1a5   :  { %v1202_v10 = vadd.f32 %v1201_v5, %v1200_v28 }
 0x1a7   :  { %v1209_v11 = vmul.f32 %v1202_v10, %v2346_v61 }
 0x1a8   :  { %v1193_v13 = vpop.f32.mrf.mxu3  ;;  %v1182_v8 = vpop.f32.mrf.mxu2 }
 0x1a9   :  { %v2453_v39 = vsub.f32 %v1142_v56, %v1209_v11  ;;  %v1194_v17 = vadd.f32 %v1193_v13, %v1181_v12  ;;  %v1253_v56 = vld [vmem:[%s2505_s5] sm:$0x3]  ;;  %v1264_v8 = vperm.slane %v1261_v60, 1  ;;  %s2273_s5 = smov [#allocation7]  }
 0x1aa   :  { %v1255_v62 = vperm.slane %v1253_v56, 0  ;;  %v1256_v14 = vperm.slane %v1253_v56, 1  ;;  %s1433_s6 = sshll.u32 %s2273_s5, 4  ;;  %s1434_s6 = int_to_ptr.vmem [resolvable:$true] %s1433_s6 }
 0x1ab   :  { %v1213_v18 = vmul.f32 %v2453_v39, %v2453_v39  ;;  %v1203_v19 = vrot.slane %v1194_v17, 4 }
 0x1ad   :  { %v1215_v53 = vrot.slane %v1213_v18, 4  ;;  %v1204_v20 = vadd.f32 %v1203_v19, %v1194_v17 }
 0x1af   :  { %v1216_v21 = vadd.f32 %v1215_v53, %v1213_v18  ;;  %v1205_v22 = vrot.slane %v1204_v20, 2 }
 0x1b0   :  { %v1195_v23 = vpop.f32.mrf.mxu3 }
 0x1b1   :  { %v1217_v26 = vrot.slane %v1216_v21, 2  ;;  %v1206_v27 = vadd.f32 %v1205_v22, %v1204_v20 }
 0x1b3   :  { %v1218_v29 = vadd.f32 %v1217_v26, %v1216_v21  ;;  %v1207_v31 = vrot.slane %v1206_v27, 1 }
 0x1b5   :  { %v1219_v34 = vrot.slane %v1218_v29, 1  ;;  %v1208_v35 = vadd.f32 %v1207_v31, %v1206_v27 }
 0x1b7   :  { %v1220_v2 = vadd.f32 %v1219_v34, %v1218_v29  ;;  %v1210_v36 = vmul.f32 %v1208_v35, %v2346_v61 }
 0x1b9   :  { %v1227_v41 = vmul.f32 %v1220_v2, %v2346_v61  ;;  %v1212_v6 = vsub.f32 %v1194_v17, %v1210_v36 }
 0x1bb   :  { %v1229_v30 = vadd.f32 1e-05, %v1227_v41  ;;  %v1214_v42 = vmul.f32 %v1212_v6, %v1212_v6 }
 0x1bd   :  { %2184 = vrsqrt.f32 %v1229_v30  ;;  %v1221_v45 = vrot.slane %v1214_v42, 4  ;;  %vm1237_vm14 = vweird.f32 %v1229_v30 }
 0x1bf   :  { %v1222_v46 = vadd.f32 %v1221_v45, %v1214_v42 }
 0x1c1   :  { %v1223_v50 = vrot.slane %v1222_v46, 2 }
 0x1c3   :  { %v2185_v44 = vpop.eup %2184  ;;  %v1224_v51 = vadd.f32 %v1223_v50, %v1222_v46 }
 0x1c4   :  { %v1232_v52 = vmul.f32 %v2185_v44, %v1229_v30  ;;  %vm1238_vm13 = vweird.f32 %v2185_v44 }
 0x1c5   :  { %v1225_v3 = vrot.slane %v1224_v51, 1  ;;  %vm1239_vm15 = vmor %vm1237_vm14, %vm1238_vm13 }
 0x1c6   :  { %v1233_v54 = vmul.f32 %v2185_v44, %v1232_v52 }
 0x1c7   :  { %v1226_v55 = vadd.f32 %v1225_v3, %v1224_v51 }
 0x1c8   :  { %v1234_v57 = vmul.f32 0.5, %v1233_v54 }
 0x1c9   :  { %v1228_v40 = vmul.f32 %v1226_v55, %v2346_v61  ;;  %v1263_v61 = vperm.slane %v1261_v60, 0 }
 0x1ca   :  { %v1235_v48 = vsub.f32 1.5, %v1234_v57 }
 0x1cb   :  { %v1230_v58 = vadd.f32 1e-05, %v1228_v40 }
 0x1cc   :  { %v1236_v59 = vmul.f32 %v2185_v44, %v1235_v48 }
 0x1cd   :  { %2186 = vrsqrt.f32 %v1230_v58  ;;  %vm1247_vm1 = vweird.f32 %v1230_v58 }
 0x1ce   :  { %v1240_v63 = vsel %vm1239_vm15, %v2185_v44, %v1236_v59 }
 0x1cf   :  { %v1251_v0 = vmul.f32 %v1240_v63, %v2453_v39 }
 0x1d1   :  { %v1259_v1 = vmul.f32 %v1255_v62, %v1251_v0 }
 0x1d3   :  { %v2187_v28 = vpop.eup %2186  ;;  %v1267_v4 = vadd.f32 %v1263_v61, %v1259_v1 }
 0x1d4   :  { %v1242_v5 = vmul.f32 %v2187_v28, %v1230_v58  ;;  %vm1248_vm0 = vweird.f32 %v2187_v28 }
 0x1d5   :  { %v1269_v7 = vmax.f32 %v1267_v4, 0.0  ;;  %vm1249_vm2 = vmor %vm1247_vm1, %vm1248_vm0 }
 0x1d6   :  { %v1243_v9 = vmul.f32 %v2187_v28, %v1242_v5 }
 0x1d7   :  { %v1271_v10 = vpack.c.bf16 %v1269_v7, %v1269_v7 }
 0x1d8   :  { %v1244_v11 = vmul.f32 0.5, %v1243_v9 }
 0x1d9   :  { %1409 = vmatmul.bf16.vlgmr.msra.gmra.mxu0 %v1271_v10 }
 0x1da   :  { %v1245_v12 = vsub.f32 1.5, %v1244_v11 }
 0x1dc   :  { %v1246_v13 = vmul.f32 %v2187_v28, %v1245_v12 }
 0x1de   :  { %v1250_v16 = vsel %vm1249_vm2, %v2187_v28, %v1246_v13 }
 0x1df   :  { %v1252_v17 = vmul.f32 %v1250_v16, %v1212_v6 }
 0x1e1   :  { %v1260_v39 = vmul.f32 %v1256_v14, %v1252_v17 }
 0x1e3   :  { %v1268_v18 = vadd.f32 %v1264_v8, %v1260_v39 }
 0x1e5   :  { %v1270_v19 = vmax.f32 %v1268_v18, 0.0 }
 0x1e7   :  { %v1272_v49 = vpack.c.bf16 %v1270_v19, %v1270_v19 }
 0x1e9   :  { %1422 = vmatmul.bf16.vlgmr.msra.gmra.mxu1 %v1272_v49 }
 0x256   :  { %v1410_v15 = vpop.f32.mrf.mxu0 }
 0x25e   :  { %v1412_v53 = vpop.f32.mrf.mxu0 }
 0x266   :  { %v1423_v20 = vpop.f32.mrf.mxu1 }
 0x267   :  { %v1424_v21 = vadd.f32 %v1423_v20, %v1410_v15 }
 0x269   :  { %1427 = vst [vmem:[#allocation7] sm:$0xff] %v1424_v21 }
 0x26a   :  { %1438 = dma.vmem_to_hbm [thread:$0]  %s1434_s6, 128, %s1436_s10, [#allocation4]  }
 0x26e   :  { %v1425_v22 = vpop.f32.mrf.mxu1 }
 0x26f   :  { %2264 = dma.done.wait [#allocation4], 128  }
 0x270   :  { %2265 = vsyncadd [#allocation4], 4294967168 }
 0x271   :  { %1443 = vsyncpa [#allocation3], 1 }
 0x272   :  { %1444 = vsyncpa [#allocation6], 1 }
 0x273   :  { %1445 = vsyncpa [#allocation4], 1 }

</bundles_post_ra>
